<compile_context>
chip_gen: v5e
topology: v5e:2x2
jax: 0.10.0
libtpu: 0.0.40
codegen_flags: <defaults>
</compile_context>

<pallas_src>
import jax
import jax.numpy as jnp
from jax.experimental import pallas as pl
from jax.experimental.pallas import tpu as pltpu

MU = 1.0
SIGMA = 1.0

LANE = 128
MIN_PALLAS_BYTES = 1 << 20  # below this, XLA's fused elementwise wins


def _vmem_capacity_bytes() -> int:
    try:
        cap = getattr(pltpu.get_tpu_info(), "vmem_capacity_bytes", None)
        if cap:
            return int(cap)
    except Exception:
        pass
    return 64 << 20  # conservative (v7x per-TC VMEM)


def _block_budget():
    """(target bytes per buffer, max resident VMEM) tuned per generation."""
    cap = _vmem_capacity_bytes()
    if cap >= (96 << 20):          # v5e / v6e: 128 MiB VMEM
        return 16 << 20, 80 << 20
    else:                          # v7x: 64 MiB per TC (32 MiB scoped default)
        return 8 << 20, 40 << 20


def _make_gaussian_kernel(mu: float, neg_inv_2sig2: float, compute_f32: bool):
    def kernel(x_ref, o_ref):
        x = x_ref[...]
        if compute_f32:
            x = x.astype(jnp.float32)   # sub-f32 inputs: clean f32 VPU/EUP path
        d = x - mu
        o_ref[...] = jnp.exp((d * d) * neg_inv_2sig2).astype(o_ref.dtype)
    return kernel


def _fallback(x, mu, sigma):
    xf = x.astype(jnp.float32) if jnp.dtype(x.dtype).itemsize < 4 else x
    return jnp.exp(-0.5 * (xf - mu) ** 2 / (sigma * sigma)).astype(x.dtype)


def gaussian_kernel(x: jax.Array, mu: float = MU, sigma: float = SIGMA,
                    *, min_pallas_bytes: int = MIN_PALLAS_BYTES) -> jax.Array:
    """Elementwise exp(-0.5*(x-mu)^2/sigma^2) via a Pallas TPU kernel.

    Accepts any shape / float dtype; returns same shape/dtype as input.
    mu/sigma are baked in as compile-time constants.
    """
    orig_shape = x.shape
    dtype = x.dtype
    itemsize = jnp.dtype(dtype).itemsize
    n = x.size
    total_bytes = n * itemsize

    # Widest lane-dense slab width (multiple of 128) dividing n -> zero-copy reshape.
    width = next((w for w in (1024, 512, 256, 128) if w != 0 and n % w == 0), None)

    # Tiny or ragged inputs: custom-call / pad overhead would dominate; XLA's
    # fused elementwise expression already runs at the HBM roofline.
    if n == 0 or width is None or total_bytes < min_pallas_bytes:
        return _fallback(x, mu, sigma)

    sub = max(8, 32 // itemsize)          # packed-sublane multiple per dtype
    rows = n // width
    slab = x.reshape(rows, width)          # zero-copy

    target_block_bytes, max_resident = _block_budget()
    block_rows = max(sub, (target_block_bytes // (width * itemsize)) // sub * sub)

    # v7x megacore: ensure >= 2 blocks for non-trivial inputs so the
    # ("parallel",) grid axis can be sharded across both TensorCores.
    if total_bytes > (2 << 20) and rows > sub:
        half_rows = -(-((rows + 1) // 2) // sub) * sub
        block_rows = min(block_rows, max(sub, half_rows))

    if block_rows >= rows:
        # Single block covering the full row extent (exempt from the 8-row rule).
        block_rows = rows

    # Partial last block (rows % block_rows != 0) is handled by Pallas; safe
    # for elementwise, and avoids any pad / slice HBM round trips.
    grid = (pl.cdiv(rows, block_rows),)

    block_bytes = block_rows * width * itemsize
    # 1 input + 1 output, double-buffered = 4 x block_bytes resident; add headroom.
    vmem_limit = min(4 * block_bytes + (8 << 20), max_resident)

    compute_f32 = itemsize < 4
    kernel = _make_gaussian_kernel(float(mu), float(-0.5 / (sigma * sigma)), compute_f32)

    out = pl.pallas_call(
        kernel,
        out_shape=jax.ShapeDtypeStruct((rows, width), dtype),
        grid_spec=pltpu.PrefetchScalarGridSpec(
            num_scalar_prefetch=0,
            grid=grid,
            in_specs=[pl.BlockSpec((block_rows, width), lambda i: (i, 0))],
            out_specs=pl.BlockSpec((block_rows, width), lambda i: (i, 0)),
        ),
        compiler_params=pltpu.CompilerParams(
            dimension_semantics=("parallel",),
            vmem_limit_bytes=vmem_limit,
        ),
    )(slab)

    return out.reshape(orig_shape)


def _reference(x, mu=MU, sigma=SIGMA):
    return jnp.exp(-0.5 * (x - mu) ** 2 / sigma ** 2)


if __name__ == "__main__":
    key = jax.random.PRNGKey(0)
    k1, k2, k3, k4 = jax.random.split(key, 4)

    # Primary test: small NCHW input (batch=2, channels=4, 16x16), f32,
    # forced through the Pallas path (single full-extent block).
    x = jax.random.normal(k1, (2, 4, 16, 16), dtype=jnp.float32)
    y = jax.block_until_ready(gaussian_kernel(x, min_pallas_bytes=0))
    assert y.shape == x.shape and y.dtype == x.dtype
    assert jnp.allclose(y, _reference(x), atol=1e-6, rtol=1e-6)

    # Multi-block path (grid >= 2, both v7x TCs busy): 4 MiB f32.
    x_big = jax.random.normal(k2, (8, 8, 128, 128), dtype=jnp.float32)
    y_big = jax.block_until_ready(gaussian_kernel(x_big))
    assert jnp.allclose(y_big, _reference(x_big), atol=1e-6, rtol=1e-6)

    # Low-precision input: kernel upcasts to f32 internally, casts back on store.
    x_bf = jax.random.normal(k3, (8, 8, 128, 128), dtype=jnp.bfloat16)
    y_bf = jax.block_until_ready(gaussian_kernel(x_bf))
    ref_bf = _reference(x_bf.astype(jnp.float32)).astype(jnp.bfloat16)
    assert y_bf.dtype == jnp.bfloat16
    assert jnp.allclose(y_bf.astype(jnp.float32), ref_bf.astype(jnp.float32),
                        atol=1e-2, rtol=1e-2)

    # Ragged element count (n % 128 != 0): plain-XLA fallback, no pad/slice passes.
    x_rag = jax.random.normal(k4, (3, 5, 7, 11), dtype=jnp.float32)
    y_rag = jax.block_until_ready(gaussian_kernel(x_rag))
    assert jnp.allclose(y_rag, _reference(x_rag), atol=1e-6, rtol=1e-6)

    print("KERNEL_OK")
</pallas_src>

<mosaic_0001>
module attributes {stable_mosaic.version = 11 : i64} {
  func.func @kernel(%arg0: i32, %arg1: memref<2x1024xf32, #tpu.memory_space<vmem>>, %arg2: memref<2x1024xf32, #tpu.memory_space<vmem>>) attributes {dimension_semantics = [#tpu.dimension_semantics<parallel>], iteration_bounds = array<i64: 1>, scalar_prefetch = 0 : i64, scratch_operands = 0 : i64, tpu.core_type = #tpu.core_type<tc>, window_params = [{transform_indices = @transform_0, window_bounds = array<i64: 2, 1024>}, {transform_indices = @transform_1, window_bounds = array<i64: 2, 1024>}]} {
    %c0 = arith.constant 0 : index
    %c0_0 = arith.constant 0 : index
    %0 = vector.load %arg1[%c0, %c0_0] : memref<2x1024xf32, #tpu.memory_space<vmem>>, vector<2x1024xf32>
    %cst = arith.constant 1.000000e+00 : f32
    %1 = vector.broadcast %cst : f32 to vector<2x1024xf32>
    %2 = arith.subf %0, %1 : vector<2x1024xf32>
    %3 = arith.mulf %2, %2 : vector<2x1024xf32>
    %cst_1 = arith.constant -5.000000e-01 : f32
    %4 = vector.broadcast %cst_1 : f32 to vector<2x1024xf32>
    %5 = arith.mulf %3, %4 : vector<2x1024xf32>
    %6 = math.exp %5 : vector<2x1024xf32>
    %c0_2 = arith.constant 0 : index
    %c0_3 = arith.constant 0 : index
    %7 = vector.load %arg2[%c0_2, %c0_3] : memref<2x1024xf32, #tpu.memory_space<vmem>>, vector<2x1024xf32>
    tpu.vector_store %arg2[%c0_2, %c0_3], %6 {strides = array<i32>} : memref<2x1024xf32, #tpu.memory_space<vmem>>, vector<2x1024xf32>,
    return
  }
  func.func @transform_0(%arg0: i32) -> (i32, i32) {
    %c0_i32 = arith.constant 0 : i32
    %c0_i32_0 = arith.constant 0 : i32
    return %arg0, %c0_i32 : i32, i32
  }
  func.func @transform_1(%arg0: i32) -> (i32, i32) {
    %c0_i32 = arith.constant 0 : i32
    %c0_i32_0 = arith.constant 0 : i32
    return %arg0, %c0_i32 : i32, i32
  }
}

</mosaic_0001>

<bundles_post_ra>
// kernel: tpu_custom_call.1
= control target key start
LH: loop header
LB: loop body
LE: loop exit
PB: predicated region body
PF: predicated region fallthrough
CT: control target
= control target key end

     0   :  { %6 = vsyncpa [#allocation3], 0  ;;  %s132_s0 = inlined_call_operand.hbm [shape: f32[2,1024], index: 0, kind: input, shape index: {}]   ;;  %s133_s1 = inlined_call_operand.hbm [shape: f32[2,1024], index: 1, kind: output, shape index: {}]  }
   0x1   :  { %7 = vsyncpa [#allocation4], 0  ;;  %s13_s8 = sshll.u32 %s132_s0, 4  ;;  %s114_s9 = smov [#allocation2]   ;;  %s14_s8 = int_to_ptr.hbm [resolvable:$true] %s13_s8 }
   0x2   :  { %s15_s10 = sshll.u32 %s114_s9, 4  ;;  %s16_s10 = int_to_ptr.vmem [resolvable:$true] %s15_s10 }
   0x3   :  { %18 = dma.hbm_to_vmem [thread:$0]  %s14_s8, 256, %s16_s10, [#allocation3]  }
   0x4   :  { %110 = dma.done.wait [#allocation3], 256  }
   0x5   :  { %111 = vsyncadd [#allocation3], 4294967040  ;;  %v23_v0 = vld [vmem:[#allocation2] sm:$0xff]  ;;  %v24_v1 = vld [vmem:[#allocation2 + $0x8] sm:$0xff]  ;;  %s115_s0 = smov [#allocation5]   ;;  %s44_s14 = sshll.u32 %s133_s1, 4  ;;  %s45_s14 = int_to_ptr.hbm [resolvable:$true] %s44_s14 }
   0x6   :  { %v54_v2 = vadd.f32 -1.0, %v23_v0  ;;  %v55_v3 = vadd.f32 -1.0, %v24_v1  ;;  %s42_s11 = sshll.u32 %s115_s0, 4  ;;  %s43_s11 = int_to_ptr.vmem [resolvable:$true] %s42_s11 }
   0x8   :  { %v27_v4 = vmul.f32 %v54_v2, %v54_v2  ;;  %v28_v5 = vmul.f32 %v55_v3, %v55_v3 }
   0xa   :  { %v29_v6 = vmul.f32 -0.5, %v27_v4  ;;  %v30_v7 = vmul.f32 -0.5, %v28_v5 }
   0xc   :  { %v31_v8 = vmul.f32 1.442695, %v29_v6  ;;  %v33_v9 = vmul.f32 1.442695, %v30_v7 }
   0xe   :  { %58 = vpow2.f32 %v31_v8 }
   0xf   :  { %60 = vpow2.f32 %v33_v9 }
  0x14   :  { %v59_v10 = vpop.eup %58 }
  0x15   :  { %v61_v11 = vpop.eup %60  ;;  %35 = vst [vmem:[#allocation5] sm:$0xff] %v59_v10 }
  0x16   :  { %36 = vst [vmem:[#allocation5 + $0x8] sm:$0xff] %v61_v11 }
  0x17   :  { %47 = dma.vmem_to_hbm [thread:$0]  %s43_s11, 256, %s45_s14, [#allocation4]  }
  0x18   :  { %112 = dma.done.wait [#allocation4], 256  }
  0x19   :  { %113 = vsyncadd [#allocation4], 4294967040 }
  0x1a   :  { %52 = vsyncpa [#allocation3], 1 }
  0x1b   :  { %53 = vsyncpa [#allocation4], 1 }

</bundles_post_ra>
